<compile_context>
chip_gen: v5e
topology: v5e:2x2
jax: 0.10.0
libtpu: 0.0.40
codegen_flags: <defaults>
</compile_context>

<pallas_src>
import jax
import jax.numpy as jnp
from jax import lax
from jax.experimental import pallas as pl
from jax.experimental.pallas import tpu as pltpu


# Contract dim 1 of the activation with dim 1 of a PyTorch (out, in) weight:
# x @ W.T without materializing any transpose.
_DN = (((1,), (1,)), ((), ()))


def mlp_kernel(x_ref, w1_ref, b1_ref, w2_ref, b2_ref, w3_ref, b3_ref, o_ref):
    # Entire (tiny) MLP hot path is fused and VMEM-resident per batch tile.
    x = x_ref[...]                                                   # (TB, in_planes)
    h1 = lax.dot_general(x, w1_ref[...], _DN,
                         preferred_element_type=jnp.float32) + b1_ref[...]
    h1 = jnp.maximum(h1, 0.0)                                        # ReLU
    h2 = lax.dot_general(h1, w2_ref[...], _DN,
                         preferred_element_type=jnp.float32) + b2_ref[...]
    h2 = jnp.maximum(h2, 0.0)                                        # ReLU
    out = lax.dot_general(h2, w3_ref[...], _DN,
                          preferred_element_type=jnp.float32) + b3_ref[...]
    o_ref[...] = out.astype(o_ref.dtype)


def mnist_toy_forward(x_nchw, params, *, tile_b=None):
    """x_nchw: (B, C, H, W) float32. params: dict of (W, b) per layer,
    W stored PyTorch-style as (out, in)."""
    B = x_nchw.shape[0]
    x_flat = x_nchw.reshape(B, -1)                                   # torch .view(B, -1)
    in_planes = x_flat.shape[1]

    (w1, b1), (w2, b2), (w3, b3) = params["fc1"], params["fc2"], params["fc3"]
    num_classes = w3.shape[0]

    # Biases as (1, out) rows for clean 2-D broadcasting on TPU.
    b1r, b2r, b3r = b1.reshape(1, -1), b2.reshape(1, -1), b3.reshape(1, -1)

    # Batch tile: multiple of 8 (sublane), capped so the double-buffered
    # (TB, in_planes) f32 tiles stay far under the v7x 32 MiB scoped VMEM
    # default.  512+ row tiles amortize per-step overhead for large B.
    if tile_b is None:
        tile_b = min(512, max(8, pl.next_power_of_2(B)))
    tile_b = max(8, (tile_b // 8) * 8)

    # Pad batch up to a multiple of the tile (sliced off below).
    Bp = pl.cdiv(B, tile_b) * tile_b
    if Bp != B:
        x_flat = jnp.pad(x_flat, ((0, Bp - B), (0, 0)))

    grid = (Bp // tile_b,)

    # Advisory cost hint for XLA's scheduler.
    flops = 2 * Bp * (in_planes * 8 + 8 * 8 + 8 * num_classes)
    bytes_accessed = 4 * (
        Bp * (in_planes + num_classes)
        + w1.size + w2.size + w3.size + b1.size + b2.size + b3.size
    )
    cost = pl.CostEstimate(flops=flops, transcendentals=0,
                           bytes_accessed=bytes_accessed)

    # Weights/biases: full-array blocks, constant index_map -> VMEM-resident
    # across all batch tiles (no re-DMA per grid step).
    resident = lambda a: pl.BlockSpec(a.shape, lambda i: (0, 0))

    out = pl.pallas_call(
        mlp_kernel,
        out_shape=jax.ShapeDtypeStruct((Bp, num_classes), jnp.float32),
        grid=grid,
        in_specs=[
            pl.BlockSpec((tile_b, in_planes), lambda i: (i, 0)),     # x tile
            resident(w1), resident(b1r),
            resident(w2), resident(b2r),
            resident(w3), resident(b3r),
        ],
        out_specs=pl.BlockSpec((tile_b, num_classes), lambda i: (i, 0)),
        compiler_params=pltpu.CompilerParams(
            dimension_semantics=("parallel",),                       # both v7x TCs
        ),
        cost_estimate=cost,
    )(x_flat, w1, b1r, w2, b2r, w3, b3r)

    return out[:B]


def init_params(key, in_planes, num_classes):
    """Deterministic synthetic init (PyTorch-style uniform fan-in bound)."""
    def linear(key, fan_in, fan_out):
        kw, kb = jax.random.split(key)
        bound = 1.0 / jnp.sqrt(fan_in)
        W = jax.random.uniform(kw, (fan_out, fan_in), jnp.float32, -bound, bound)
        b = jax.random.uniform(kb, (fan_out,), jnp.float32, -bound, bound)
        return W, b

    k1, k2, k3 = jax.random.split(key, 3)
    return {
        "fc1": linear(k1, in_planes, 8),
        "fc2": linear(k2, 8, 8),
        "fc3": linear(k3, 8, num_classes),
    }


def reference_forward(x_nchw, params):
    """Pure-JAX reference mirroring the PyTorch module."""
    B = x_nchw.shape[0]
    h = x_nchw.reshape(B, -1)
    (w1, b1), (w2, b2), (w3, b3) = params["fc1"], params["fc2"], params["fc3"]
    h = jnp.maximum(h @ w1.T + b1, 0.0)
    h = jnp.maximum(h @ w2.T + b2, 0.0)
    return h @ w3.T + b3


if __name__ == "__main__":
    # Small MNIST-like toy shapes: image_size = (C, H, W) = (1, 16, 16), 10 classes.
    image_size = (1, 16, 16)
    num_classes = 10
    batch = 16
    in_planes = image_size[0] * image_size[1] * image_size[2]

    key = jax.random.PRNGKey(0)
    k_x, k_p = jax.random.split(key)
    x = jax.random.normal(k_x, (batch,) + image_size, dtype=jnp.float32)  # NCHW
    params = init_params(k_p, in_planes, num_classes)

    # tile_b=8 so the 1-D batch grid (grid=(2,)) and resident-weight index maps
    # are exercised even at this small test batch.
    y = mnist_toy_forward(x, params, tile_b=8)
    y = jax.block_until_ready(y)

    y_ref = reference_forward(x, params)
    assert y.shape == (batch, num_classes)
    assert jnp.allclose(y, y_ref, atol=1e-5, rtol=1e-5), "mismatch vs reference"

    print("KERNEL_OK")
</pallas_src>

<mosaic_0001>
module attributes {stable_mosaic.version = 11 : i64} {
  func.func @mlp_kernel(%arg0: i32, %arg1: memref<8x256xf32, #tpu.memory_space<vmem>>, %arg2: memref<8x256xf32, #tpu.memory_space<vmem>>, %arg3: memref<1x8xf32, #tpu.memory_space<vmem>>, %arg4: memref<8x8xf32, #tpu.memory_space<vmem>>, %arg5: memref<1x8xf32, #tpu.memory_space<vmem>>, %arg6: memref<10x8xf32, #tpu.memory_space<vmem>>, %arg7: memref<1x10xf32, #tpu.memory_space<vmem>>, %arg8: memref<8x10xf32, #tpu.memory_space<vmem>>) attributes {dimension_semantics = [#tpu.dimension_semantics<parallel>], iteration_bounds = array<i64: 2>, scalar_prefetch = 0 : i64, scratch_operands = 0 : i64, tpu.core_type = #tpu.core_type<tc>, window_params = [{transform_indices = @transform_0, window_bounds = array<i64: 8, 256>}, {pipeline_mode = #tpu.pipeline_mode<synchronous>, transform_indices = @transform_1, window_bounds = array<i64: 8, 256>}, {pipeline_mode = #tpu.pipeline_mode<synchronous>, transform_indices = @transform_2, window_bounds = array<i64: 1, 8>}, {pipeline_mode = #tpu.pipeline_mode<synchronous>, transform_indices = @transform_3, window_bounds = array<i64: 8, 8>}, {pipeline_mode = #tpu.pipeline_mode<synchronous>, transform_indices = @transform_4, window_bounds = array<i64: 1, 8>}, {pipeline_mode = #tpu.pipeline_mode<synchronous>, transform_indices = @transform_5, window_bounds = array<i64: 10, 8>}, {pipeline_mode = #tpu.pipeline_mode<synchronous>, transform_indices = @transform_6, window_bounds = array<i64: 1, 10>}, {transform_indices = @transform_7, window_bounds = array<i64: 8, 10>}]} {
    %c0 = arith.constant 0 : index
    %c0_0 = arith.constant 0 : index
    %0 = vector.load %arg1[%c0, %c0_0] : memref<8x256xf32, #tpu.memory_space<vmem>>, vector<8x256xf32>
    %c0_1 = arith.constant 0 : index
    %c0_2 = arith.constant 0 : index
    %1 = vector.load %arg2[%c0_1, %c0_2] : memref<8x256xf32, #tpu.memory_space<vmem>>, vector<8x256xf32>
    %cst = arith.constant dense<0.000000e+00> : vector<8x8xf32>
    %2 = tpu.matmul %0, %1, %cst {dimension_numbers = #tpu.dot_dimension_numbers<[1], [1], [0], [0], [0, 0, 1, 0], [], []>} : vector<8x256xf32>, vector<8x256xf32>, vector<8x8xf32> -> vector<8x8xf32>
    %c0_3 = arith.constant 0 : index
    %c0_4 = arith.constant 0 : index
    %3 = vector.load %arg3[%c0_3, %c0_4] : memref<1x8xf32, #tpu.memory_space<vmem>>, vector<1x8xf32>
    %4 = vector.broadcast %3 : vector<1x8xf32> to vector<8x8xf32>
    %5 = arith.addf %2, %4 : vector<8x8xf32>
    %cst_5 = arith.constant 0.000000e+00 : f32
    %6 = vector.broadcast %cst_5 : f32 to vector<8x8xf32>
    %7 = arith.maximumf %5, %6 : vector<8x8xf32>
    %c0_6 = arith.constant 0 : index
    %c0_7 = arith.constant 0 : index
    %8 = vector.load %arg4[%c0_6, %c0_7] : memref<8x8xf32, #tpu.memory_space<vmem>>, vector<8x8xf32>
    %cst_8 = arith.constant dense<0.000000e+00> : vector<8x8xf32>
    %9 = tpu.matmul %7, %8, %cst_8 {dimension_numbers = #tpu.dot_dimension_numbers<[1], [1], [0], [0], [0, 0, 1, 0], [], []>} : vector<8x8xf32>, vector<8x8xf32>, vector<8x8xf32> -> vector<8x8xf32>
    %c0_9 = arith.constant 0 : index
    %c0_10 = arith.constant 0 : index
    %10 = vector.load %arg5[%c0_9, %c0_10] : memref<1x8xf32, #tpu.memory_space<vmem>>, vector<1x8xf32>
    %11 = vector.broadcast %10 : vector<1x8xf32> to vector<8x8xf32>
    %12 = arith.addf %9, %11 : vector<8x8xf32>
    %cst_11 = arith.constant 0.000000e+00 : f32
    %13 = vector.broadcast %cst_11 : f32 to vector<8x8xf32>
    %14 = arith.maximumf %12, %13 : vector<8x8xf32>
    %c0_12 = arith.constant 0 : index
    %c0_13 = arith.constant 0 : index
    %15 = vector.load %arg6[%c0_12, %c0_13] : memref<10x8xf32, #tpu.memory_space<vmem>>, vector<10x8xf32>
    %cst_14 = arith.constant dense<0.000000e+00> : vector<8x10xf32>
    %16 = tpu.matmul %14, %15, %cst_14 {dimension_numbers = #tpu.dot_dimension_numbers<[1], [1], [0], [0], [0, 0, 1, 0], [], []>} : vector<8x8xf32>, vector<10x8xf32>, vector<8x10xf32> -> vector<8x10xf32>
    %c0_15 = arith.constant 0 : index
    %c0_16 = arith.constant 0 : index
    %17 = vector.load %arg7[%c0_15, %c0_16] : memref<1x10xf32, #tpu.memory_space<vmem>>, vector<1x10xf32>
    %18 = vector.broadcast %17 : vector<1x10xf32> to vector<8x10xf32>
    %19 = arith.addf %16, %18 : vector<8x10xf32>
    %c0_17 = arith.constant 0 : index
    %c0_18 = arith.constant 0 : index
    %20 = vector.load %arg8[%c0_17, %c0_18] : memref<8x10xf32, #tpu.memory_space<vmem>>, vector<8x10xf32>
    tpu.vector_store %arg8[%c0_17, %c0_18], %19 {strides = array<i32>} : memref<8x10xf32, #tpu.memory_space<vmem>>, vector<8x10xf32>,
    return
  }
  func.func @transform_0(%arg0: i32) -> (i32, i32) {
    %c0_i32 = arith.constant 0 : i32
    %c0_i32_0 = arith.constant 0 : i32
    return %arg0, %c0_i32 : i32, i32
  }
  func.func @transform_1(%arg0: i32) -> (i32, i32) {
    %c0_i32 = arith.constant 0 : i32
    %c0_i32_0 = arith.constant 0 : i32
    %c0_i32_1 = arith.constant 0 : i32
    return %c0_i32, %c0_i32_0 : i32, i32
  }
  func.func @transform_2(%arg0: i32) -> (i32, i32) {
    %c0_i32 = arith.constant 0 : i32
    %c0_i32_0 = arith.constant 0 : i32
    %c0_i32_1 = arith.constant 0 : i32
    return %c0_i32, %c0_i32_0 : i32, i32
  }
  func.func @transform_3(%arg0: i32) -> (i32, i32) {
    %c0_i32 = arith.constant 0 : i32
    %c0_i32_0 = arith.constant 0 : i32
    %c0_i32_1 = arith.constant 0 : i32
    return %c0_i32, %c0_i32_0 : i32, i32
  }
  func.func @transform_4(%arg0: i32) -> (i32, i32) {
    %c0_i32 = arith.constant 0 : i32
    %c0_i32_0 = arith.constant 0 : i32
    %c0_i32_1 = arith.constant 0 : i32
    return %c0_i32, %c0_i32_0 : i32, i32
  }
  func.func @transform_5(%arg0: i32) -> (i32, i32) {
    %c0_i32 = arith.constant 0 : i32
    %c0_i32_0 = arith.constant 0 : i32
    %c0_i32_1 = arith.constant 0 : i32
    return %c0_i32, %c0_i32_0 : i32, i32
  }
  func.func @transform_6(%arg0: i32) -> (i32, i32) {
    %c0_i32 = arith.constant 0 : i32
    %c0_i32_0 = arith.constant 0 : i32
    %c0_i32_1 = arith.constant 0 : i32
    return %c0_i32, %c0_i32_0 : i32, i32
  }
  func.func @transform_7(%arg0: i32) -> (i32, i32) {
    %c0_i32 = arith.constant 0 : i32
    %c0_i32_0 = arith.constant 0 : i32
    return %arg0, %c0_i32 : i32, i32
  }
}

</mosaic_0001>

<bundles_post_ra>
// kernel: tpu_custom_call.1
= control target key start
LH: loop header
LB: loop body
LE: loop exit
PB: predicated region body
PF: predicated region fallthrough
CT: control target
= control target key end

     0   :  { %12 = vsyncpa [#allocation3], 0  ;;  %s865_s0 = inlined_call_operand.hbm [shape: f32[16,256], index: 0, kind: input, shape index: {}]   ;;  %s866_s1 = inlined_call_operand.vmem [shape: f32[8,256], index: 1, kind: input, shape index: {}]   ;;  %s867_s2 = inlined_call_operand.vmem [shape: f32[1,8], index: 2, kind: input, shape index: {}]   ;;  %s868_s3 = inlined_call_operand.vmem [shape: f32[8,8], index: 3, kind: input, shape index: {}]   ;;  %s869_s4 = inlined_call_operand.vmem [shape: f32[1,8], index: 4, kind: input, shape index: {}]   ;;  %s870_s5 = inlined_call_operand.vmem [shape: f32[10,8], index: 5, kind: input, shape index: {}]   ;;  %s871_s6 = inlined_call_operand.vmem [shape: f32[1,10], index: 6, kind: input, shape index: {}]   ;;  %s872_s7 = inlined_call_operand.hbm [shape: f32[16,10], index: 7, kind: output, shape index: {}]  }
   0x1   :  { %14 = vsyncpa [#allocation3 + $0x1], 0 }
   0x2   :  { %15 = vsyncpa [#allocation4], 0 }
   0x3   :  { %17 = vsyncpa [#allocation4 + $0x1], 0  ;;  %s708_s24 = smov 0   ;;  %s710_s25 = smov 0  }
   0x4   :  { %s712_s26 = smov 0   ;;  %s714_s27 = smov 0  }
   0x5 LB: > { %s729_s28 = sadd.s32 4294967295, %s666_s27   ;;  %s502_s29 = sadd.s32 4294967294, %s666_s27   ;;  %s666_s27 = sphi %s714_s27, %s884_s27   ;;  %s662_s26 = sphi %s712_s26, %s883_s26   ;;  %s658_s25 = sphi %s710_s25, %s882_s25   ;;  %s654_s24 = sphi %s708_s24, %s881_s24  }
   0x6   : > { %s733_s30 = sadd.s32 1, %s666_s27   ;;  %s30_s8 = sadd.s32 1, %s662_s26 }
   0x7   : > { %s27_s9 = ssub.s32 %s666_s27, %s733_s30  ;;  %p37_p0 = scmp.ne.s32.totalorder %s662_s26, %s658_s25 }
   0x8   : > { %p28_p1 = scmp.eq.s32.totalorder %s27_s9, 0  ;;  %p38_p2 = scmp.eq.s32.totalorder %s666_s27, 0 }
   0x9   : > { %p43_p3 = scmp.ne.s32.totalorder %s658_s25, %s654_s24  ;;  %p44_p4 = scmp.eq.s32.totalorder %s729_s28, 0 }
   0xa   : > { %s745_s10 = scalar_select %p28_p1, %s662_s26, %s30_s8  }
   0xb   : > { %p747_p5 = por %p38_p2, %p37_p0  ;;  %p751_p6 = por %p44_p4, %p43_p3 }
   0xc   : > { %873 = sst [smem:[#allocation8_spill]] %s745_s10  ;;  %p193_p7 = scmp.eq.s32.totalorder %s729_s28, 1 }
   0xd   : > { %p199_p8 = scmp.eq.s32.totalorder %s502_s29, 1  ;;  %p533_p10 = scmp.lt.s32.totalorder %s666_s27, 2 }
   0xe   : > { %p758_p11 = por %p193_p7, %p37_p0  ;;  %s237_s15 = sand.u32 1, %s662_s26  }
   0xf   : > { %p762_p12 = por %p199_p8, %p43_p3  ;;  %s520_s16 = sshll.u32 %s666_s27, 4 }
  0x10   : > { %s505_s17 = sshll.u32 %s237_s15, 4  ;;  %s246_s20 = scalar_lea.hbm %s865_s0, %s520_s16 }
  0x11   : > { %s248_s21 = sshll.u32 %s246_s20, 4  ;;  %s241_s22 = scalar_lea.vmem [#allocation2], %s505_s17  ;;  %s249_s21 = int_to_ptr.hbm [resolvable:$true] %s248_s21 }
  0x12   : > { %s250_s23 = sshll.u32 %s241_s22, 4  ;;  %p773_p13 = pnand %p533_p10, %p747_p5  ;;  %s251_s23 = int_to_ptr.vmem [resolvable:$true] %s250_s23 }
  0x13   : > { %p508_p0 = scmp.ge.s32.totalorder %s666_s27, 1  ;;  %p255_p1 = scmp.lt.s32.totalorder %s666_s27, 3 }
  0x14   : > { %s238_s8 = scalar_lea.sflag [#allocation3], %s237_s15  ;;  %s570_s9 = sshra.s32 %s249_s21, 4  ;;  %s571_s9 = int_to_ptr.hbm [resolvable:$true] %s570_s9 }
  0x15   : > { %s572_s10 = scalar_lea.hbm %s571_s9, 16  ;;  %p574_p3 = pneg %p773_p13 }
  0x16   : > { %p573_p2 = scmp.ne.s32.totalorder %s571_s9, %s572_s10  ;;  %s577_s11 = scalar_lea.hbm %s865_s0, 32 }
  0x17   : > { %p578_p5 = scmp.lt.s32.totalorder %s571_s9, %s865_s0  ;;  %p579_p8 = scmp.lt.s32.totalorder %s577_s11, %s572_s10 }
  0x18   : > { %p575_p4 = pnand %p574_p3, %p573_p2 }
  0x19   : > { %p580_p10 = por %p579_p8, %p578_p5 }
  0x1a   : > { %p576_p7 = pneg %p575_p4 }
  0x1c   : > { %p581_p9 = pnand %p580_p10, %p576_p7 }
  0x1e   : > { %584 = shalt.err (!%p581_p9)
}
  0x1f   : > { %528 = dma.hbm_to_vmem [thread:$0]  (!%p773_p13), %s249_s21, 256, %s251_s23, %s238_s8  }
  0x20   : > { %p256_p2 = pnand %p508_p0, %p255_p1 }
  0x21   : > { %s794_s15 = sand.u32 (!%p256_p2), 1, %s658_s25  }
  0x22   : > { %259 = sbr.rel (%p256_p2) target bundleno = 449 (0x1c1), region = 48  ;;  %s509_s20 = sshll.u32 (!%p256_p2), %s794_s15, 4 }
  0x23   : > { %s262_s10 = scalar_lea.sflag (!%p256_p2), [#allocation3], %s794_s15  ;;  %s265_s22 = scalar_lea.vmem (!%p256_p2), [#allocation2], %s509_s20 }
  0x27   : > { %645 = dma.done.wait (%p751_p6), %s262_s10, 256  }
  0x28   : > { %647 = vsyncadd (%p751_p6), %s262_s10, 4294967040  ;;  %v299_v0 = vld [vmem:[%s866_s1] sm:$0xff]  ;;  %v300_v1 = vld [vmem:[%s866_s1 + $0x8] sm:$0xff]  ;;  %vm351_vm0 = vcmask 64512   ;;  %s510_s29 = sshll.u32 %s794_s15, 3  ;;  %s517_s21 = sshll.u32 %s729_s28, 3 }
  0x29   : > { %320 = vmatpush.xpose.msra.mxu0 %v299_v0  ;;  %340 = vmatpush.xpose.msra.mxu1 %v300_v1  ;;  %v297_v2 = vld [vmem:[%s265_s22] sm:$0xff]  ;;  %v298_v3 = vld [vmem:[%s265_s22 + $0x8] sm:$0xff]  ;;  %s427_s9 = scalar_lea.hbm %s872_s7, %s517_s21  ;;  %s296_s17 = scalar_lea.vmem [#allocation5], %s510_s29  ;;  %vm414_vm1 = vcmask 80896  }
  0x2a   : > { %v346_v4 = vld [vmem:[%s868_s3] sm:$0xff]  ;;  %v380_v5 = vld [vmem:[%s870_s5 + $0x8] sm:$0x3]  ;;  %s429_s11 = sshll.u32 %s296_s17, 4  ;;  %s431_s18 = sshll.u32 %s427_s9, 4  ;;  %s430_s11 = int_to_ptr.vmem [resolvable:$true] %s429_s11  ;;  %s432_s18 = int_to_ptr.hbm [resolvable:$true] %s431_s18 }
  0x2b   : > { %511 = vmatpush.xpose.msk.msra.mxu2 %vm351_vm0, %v346_v4  ;;  %513 = vmatpush.xpose.msk.msra.mxu3 %vm351_vm0, %v380_v5  ;;  %v567_v6 = vld [vmem:[%s867_s2] ss:$0 sm:$0xff]  ;;  %s417_s19 = scalar_lea.sflag [#allocation4], %s794_s15  ;;  %s614_s28 = sshra.s32 %s432_s18, 4  ;;  %s615_s28 = int_to_ptr.hbm [resolvable:$true] %s614_s28 }
  0x2c   : > { %321 = vmatmul.f32.vlgmr.msra.gmra.mxu0 %v297_v2  ;;  %341 = vmatmul.f32.vlgmr.msra.gmra.mxu1 %v298_v3  ;;  %v379_v12 = vld [vmem:[%s870_s5] sm:$0xff]  ;;  %s616_s20 = scalar_lea.hbm %s615_s28, 8  ;;  %s620_s29 = scalar_lea.hbm %s872_s7, 16 }
  0x2d   : > { %v568_v13 = vld [vmem:[%s869_s4] ss:$0 sm:$0xff]  ;;  %p617_p6 = scmp.ne.s32.totalorder %s615_s28, %s616_s20  ;;  %p621_p0 = scmp.lt.s32.totalorder %s615_s28, %s872_s7 }
  0x2e   : > { %v569_v17 = vld [vmem:[%s871_s6] ss:$0 sm:$0xff]  ;;  %p622_p1 = scmp.lt.s32.totalorder %s620_s29, %s616_s20 }
  0x2f   : > { %514 = vmatpush.xpose.msk.msra.mxu3 %vm351_vm0, %v379_v12  ;;  %p618_p9 = pnand %p617_p6, %p758_p11 }
  0x30   : > { %p623_p3 = por %p622_p1, %p621_p0 }
  0x31   : > { %p619_p13 = pneg %p618_p9 }
  0x33   : > { %p624_p4 = pnand %p623_p3, %p619_p13 }
  0xa9   : > { %v322_v7 = vpop.f32.mrf.mxu0  ;;  %v342_v8 = vpop.f32.mrf.mxu1 }
  0xaa   : > { %v323_v9 = vadd.f32 %v567_v6, %v322_v7 }
  0xac   : > { %v343_v10 = vadd.f32 %v342_v8, %v323_v9 }
  0xae   : > { %v345_v11 = vmax.f32 %v343_v10, 0.0 }
  0xb0   : > { %512 = vmatmul.msk.f32.vlgmr.msra.gmra.mxu2 %vm351_vm0, %v345_v11 }
 0x133   : > { %v375_v14 = vpop.f32.mrf.mxu2 }
 0x134   : > { %v376_v15 = vadd.f32 %v568_v13, %v375_v14 }
 0x136   : > { %v378_v16 = vmax.f32 %v376_v15, 0.0 }
 0x138   : > { %515 = vmatmul.msk.f32.vlgmr.msra.gmra.mxu3 %vm351_vm0, %v378_v16 }
 0x1bb   : > { %v411_v18 = vpop.f32.mrf.mxu3 }
 0x1bc   : > { %v412_v19 = vadd.f32 %v569_v17, %v411_v18 }
 0x1be   : > { %415 = vst.msk [vmem:[%s296_s17] sm:$0xff] %vm414_vm1, %v412_v19 }
 0x1bf   : > { %627 = shalt.err (!%p624_p4)
}
 0x1c0   : > { %523 = dma.vmem_to_hbm [thread:$0]  (%p758_p11), %s430_s11, 128, %s432_s18, %s417_s19  }
 0x1c1 PF: > { %s443_s15 = sand.u32 1, %s654_s24   ;;  %p879_p7 = scmp.ge.s32.totalorder %s666_s27, 2 }
 0x1c2   : > { %s444_s8 = scalar_lea.sflag [#allocation4], %s443_s15 }
 0x1c3   : > { %p530_p5 = pnand %p879_p7, %p762_p12 }
 0x1c5   : > { %p531_p8 = pneg %p530_p5 }
 0x1c7   : > { %649 = dma.done.wait (%p531_p8), %s444_s8, 128  }
 0x1c8   : > { %651 = vsyncadd (%p531_p8), %s444_s8, 4294967168  ;;  %s880_s9 = sld [smem:[#allocation8_spill]]  ;;  %p20_p10 = scmp.ge.s32.totalorder %s733_s30, 4  }
 0x1c9   : > { %s881_s24 = smov %s658_s25  ;;  %s882_s25 = smov %s662_s26 }
 0x1ca   : > { %s884_s27 = smov %s733_s30  ;;  %22 = sbr.rel (!%p20_p10) target bundleno = 5 (0x5), region = 93 }
 0x1ce   : > { %s883_s26 = smov %s880_s9 }
 0x1cf   :  { %450 = vsyncpa [#allocation3], 1 }
 0x1d0   :  { %452 = vsyncpa [#allocation3 + $0x1], 1 }
 0x1d1   :  { %453 = vsyncpa [#allocation4], 1 }
 0x1d2   :  { %455 = vsyncpa [#allocation4 + $0x1], 1 }

</bundles_post_ra>
